<compile_context>
chip_gen: v7x
topology: tpu7x:2x2x1
jax: 0.10.0
libtpu: 0.0.40
codegen_flags: <defaults>
</compile_context>

<pallas_src>
import functools

import jax
import jax.numpy as jnp
from jax.experimental import pallas as pl
from jax.experimental.pallas import tpu as pltpu

IN_FEATURES = 201 * 3     # 603
IN_PAD = 640              # 603 padded up to 5 * 128 lanes
HIDDEN = 128
LATENT = 64
LATENT_PAD = 128          # latent path padded to a full 128-lane vreg


def _round_up(n, m):
    return ((n + m - 1) // m) * m


def _mish(x):
    # mish(x) = x * tanh(softplus(x)) = x * t(t+2) / (t(t+2)+2), t = exp(x)
    # Clamp the exp argument (and pass x straight through for large x) so the
    # single-exp form never overflows float32.
    t = jnp.exp(jnp.minimum(x, 20.0))
    u = t * (t + 2.0)
    soft_tanh = u * pl.reciprocal(u + 2.0, approx=True)
    return jnp.where(x > 20.0, x, x * soft_tanh)


def inertial_encoder_kernel(x_ref,
                            w1_ref, b1_ref,
                            w2_ref, b2_ref,
                            w3_ref, b3_ref,
                            w4_ref, b4_ref,
                            o_ref):
    x = x_ref[...]                                              # (TM, 640)

    # inertial_encoder: Linear(603,128) -> Mish -> Dropout(identity) -> Linear(128,64)
    h1 = jnp.dot(x, w1_ref[...], preferred_element_type=jnp.float32) + b1_ref[...]
    h1 = _mish(h1)
    # TODO(synk): Dropout(p=0.2) is a no-op in eval mode; train-mode masking not implemented.
    z = jnp.dot(h1, w2_ref[...], preferred_element_type=jnp.float32) + b2_ref[...]

    # fc: Linear(64,64) -> Mish -> Linear(64,64)   (run at 128 padded lanes)
    h2 = jnp.dot(z, w3_ref[...], preferred_element_type=jnp.float32) + b3_ref[...]
    h2 = _mish(h2)
    y = jnp.dot(h2, w4_ref[...], preferred_element_type=jnp.float32) + b4_ref[...]

    # F.normalize(y, dim=-1): y / max(||y||, eps), eps=1e-12.
    # Padded lanes of y are exactly zero, so the sum over 128 lanes equals the
    # sum over the real 64. rsqrt(max(sum_sq, eps^2)) == 1/max(||y||, eps).
    sum_sq = jnp.sum(y * y, axis=-1, keepdims=True)
    inv = jax.lax.rsqrt(jnp.maximum(sum_sq, 1e-24))
    o_ref[...] = y * inv


def _pad_params(params):
    """Zero-pad weights/biases to lane-friendly shapes (math is unchanged)."""
    w1, b1, w2, b2, w3, b3, w4, b4 = params
    f32 = jnp.float32
    w1p = jnp.pad(w1.astype(f32), ((0, IN_PAD - IN_FEATURES), (0, 0)))
    b1p = b1.reshape(1, HIDDEN).astype(f32)
    w2p = jnp.pad(w2.astype(f32), ((0, 0), (0, LATENT_PAD - LATENT)))
    b2p = jnp.pad(b2.reshape(1, LATENT).astype(f32), ((0, 0), (0, LATENT_PAD - LATENT)))
    w3p = jnp.pad(w3.astype(f32), ((0, LATENT_PAD - LATENT), (0, LATENT_PAD - LATENT)))
    b3p = jnp.pad(b3.reshape(1, LATENT).astype(f32), ((0, 0), (0, LATENT_PAD - LATENT)))
    w4p = jnp.pad(w4.astype(f32), ((0, LATENT_PAD - LATENT), (0, LATENT_PAD - LATENT)))
    b4p = jnp.pad(b4.reshape(1, LATENT).astype(f32), ((0, 0), (0, LATENT_PAD - LATENT)))
    return (w1p, b1p, w2p, b2p, w3p, b3p, w4p, b4p)


@functools.partial(jax.jit, static_argnames=("tm",))
def inertial_encoder_forward(inertial, params, *, tm=256):
    """inertial: (B, 201, 3) float32; params: tuple of weights/biases."""
    B = inertial.shape[0]
    x = inertial.reshape(B, IN_FEATURES).astype(jnp.float32)
    # Lane-pad K: 603 -> 640 zero columns (w1 rows are zero-padded to match).
    x = jnp.pad(x, ((0, 0), (0, IN_PAD - IN_FEATURES)))

    # Batch tiling: tile size is a multiple of 8 sublanes, batch zero-padded
    # up to a multiple of the tile (extra rows are discarded after the call).
    tm = min(tm, _round_up(B, 8))
    b_pad = _round_up(B, tm)
    if b_pad != B:
        x = jnp.pad(x, ((0, b_pad - B), (0, 0)))

    padded = _pad_params(params)
    grid = (b_pad // tm,)

    x_spec = pl.BlockSpec((tm, IN_PAD), lambda i: (i, 0))
    # Weights/biases: one full block, constant index_map -> resident in VMEM.
    w_specs = [pl.BlockSpec(p.shape, lambda i: (0, 0)) for p in padded]
    out_spec = pl.BlockSpec((tm, LATENT_PAD), lambda i: (i, 0))

    flops = 2 * b_pad * (IN_PAD * HIDDEN + HIDDEN * LATENT_PAD + 2 * LATENT_PAD * LATENT_PAD)
    transcendentals = b_pad * (HIDDEN + LATENT_PAD + 1)           # 2x mish exp + rsqrt
    bytes_accessed = 4 * (x.size + sum(p.size for p in padded) + b_pad * LATENT_PAD)

    out = pl.pallas_call(
        inertial_encoder_kernel,
        grid=grid,
        in_specs=[x_spec] + w_specs,
        out_specs=out_spec,
        out_shape=jax.ShapeDtypeStruct((b_pad, LATENT_PAD), jnp.float32),
        compiler_params=pltpu.CompilerParams(
            dimension_semantics=("parallel",)),
        cost_estimate=pl.CostEstimate(
            flops=flops,
            transcendentals=transcendentals,
            bytes_accessed=bytes_accessed),
    )(x, *padded)

    return out[:B, :LATENT]


def init_params(key):
    """Deterministic synthetic parameters with nn.Linear-like scaling."""
    ks = jax.random.split(key, 8)

    def linear(kw, kb, fan_in, fan_out):
        bound = 1.0 / jnp.sqrt(fan_in)
        w = jax.random.uniform(kw, (fan_in, fan_out), jnp.float32, -bound, bound)
        b = jax.random.uniform(kb, (1, fan_out), jnp.float32, -bound, bound)
        return w, b

    w1, b1 = linear(ks[0], ks[1], IN_FEATURES, HIDDEN)
    w2, b2 = linear(ks[2], ks[3], HIDDEN, LATENT)
    w3, b3 = linear(ks[4], ks[5], LATENT, LATENT)
    w4, b4 = linear(ks[6], ks[7], LATENT, LATENT)
    return (w1, b1, w2, b2, w3, b3, w4, b4)


def reference_forward(inertial, params):
    """Pure-JAX reference (exact softplus/tanh Mish) for correctness check."""
    w1, b1, w2, b2, w3, b3, w4, b4 = params
    x = inertial.reshape(inertial.shape[0], -1).astype(jnp.float32)

    def mish(v):
        return v * jnp.tanh(jax.nn.softplus(v))

    h1 = mish(x @ w1 + b1)
    z = h1 @ w2 + b2
    h2 = mish(z @ w3 + b3)
    y = h2 @ w4 + b4
    norm = jnp.sqrt(jnp.sum(y * y, axis=-1, keepdims=True))
    return y / jnp.maximum(norm, 1e-12)


if __name__ == "__main__":
    key = jax.random.PRNGKey(0)
    k_param, k_input = jax.random.split(key)

    params = init_params(k_param)
    inertial = jax.random.normal(k_input, (8, 201, 3), dtype=jnp.float32)

    out = inertial_encoder_forward(inertial, params)
    out = jax.block_until_ready(out)

    ref = reference_forward(inertial, params)
    assert out.shape == (8, LATENT)
    # Tolerance is slightly looser than f32 round-off because the kernel uses
    # the EUP approximate reciprocal in Mish (by design, per perf review).
    assert jnp.allclose(out, ref, atol=5e-3, rtol=5e-3), "mismatch vs reference"

    print("KERNEL_OK")
</pallas_src>

<mosaic_0001>
module attributes {stable_mosaic.version = 11 : i64} {
  func.func @inertial_encoder_kernel(%arg0: i32, %arg1: memref<8x640xf32, #tpu.memory_space<vmem>>, %arg2: memref<640x128xf32, #tpu.memory_space<vmem>>, %arg3: memref<1x128xf32, #tpu.memory_space<vmem>>, %arg4: memref<128x128xf32, #tpu.memory_space<vmem>>, %arg5: memref<1x128xf32, #tpu.memory_space<vmem>>, %arg6: memref<128x128xf32, #tpu.memory_space<vmem>>, %arg7: memref<1x128xf32, #tpu.memory_space<vmem>>, %arg8: memref<128x128xf32, #tpu.memory_space<vmem>>, %arg9: memref<1x128xf32, #tpu.memory_space<vmem>>, %arg10: memref<8x128xf32, #tpu.memory_space<vmem>>) attributes {dimension_semantics = [#tpu.dimension_semantics<parallel>], iteration_bounds = array<i64: 1>, scalar_prefetch = 0 : i64, scratch_operands = 0 : i64, tpu.core_type = #tpu.core_type<tc>, window_params = [{transform_indices = @transform_0, window_bounds = array<i64: 8, 640>}, {pipeline_mode = #tpu.pipeline_mode<synchronous>, transform_indices = @transform_1, window_bounds = array<i64: 640, 128>}, {pipeline_mode = #tpu.pipeline_mode<synchronous>, transform_indices = @transform_2, window_bounds = array<i64: 1, 128>}, {pipeline_mode = #tpu.pipeline_mode<synchronous>, transform_indices = @transform_3, window_bounds = array<i64: 128, 128>}, {pipeline_mode = #tpu.pipeline_mode<synchronous>, transform_indices = @transform_4, window_bounds = array<i64: 1, 128>}, {pipeline_mode = #tpu.pipeline_mode<synchronous>, transform_indices = @transform_5, window_bounds = array<i64: 128, 128>}, {pipeline_mode = #tpu.pipeline_mode<synchronous>, transform_indices = @transform_6, window_bounds = array<i64: 1, 128>}, {pipeline_mode = #tpu.pipeline_mode<synchronous>, transform_indices = @transform_7, window_bounds = array<i64: 128, 128>}, {pipeline_mode = #tpu.pipeline_mode<synchronous>, transform_indices = @transform_8, window_bounds = array<i64: 1, 128>}, {transform_indices = @transform_9, window_bounds = array<i64: 8, 128>}]} {
    %c0 = arith.constant 0 : index
    %c0_0 = arith.constant 0 : index
    %0 = vector.load %arg1[%c0, %c0_0] : memref<8x640xf32, #tpu.memory_space<vmem>>, vector<8x640xf32>
    %c0_1 = arith.constant 0 : index
    %c0_2 = arith.constant 0 : index
    %1 = vector.load %arg2[%c0_1, %c0_2] : memref<640x128xf32, #tpu.memory_space<vmem>>, vector<640x128xf32>
    %cst = arith.constant dense<0.000000e+00> : vector<8x128xf32>
    %2 = tpu.matmul %0, %1, %cst {dimension_numbers = #tpu.dot_dimension_numbers<[1], [0], [0], [1], [0, 0, 1, 1], [], []>} : vector<8x640xf32>, vector<640x128xf32>, vector<8x128xf32> -> vector<8x128xf32>
    %c0_3 = arith.constant 0 : index
    %c0_4 = arith.constant 0 : index
    %3 = vector.load %arg3[%c0_3, %c0_4] : memref<1x128xf32, #tpu.memory_space<vmem>>, vector<1x128xf32>
    %4 = vector.broadcast %3 : vector<1x128xf32> to vector<8x128xf32>
    %5 = arith.addf %2, %4 : vector<8x128xf32>
    %cst_5 = arith.constant 2.000000e+01 : f32
    %6 = vector.broadcast %cst_5 : f32 to vector<8x128xf32>
    %7 = arith.minimumf %5, %6 : vector<8x128xf32>
    %8 = math.exp %7 : vector<8x128xf32>
    %cst_6 = arith.constant 2.000000e+00 : f32
    %9 = vector.broadcast %cst_6 : f32 to vector<8x128xf32>
    %10 = arith.addf %8, %9 : vector<8x128xf32>
    %11 = arith.mulf %8, %10 : vector<8x128xf32>
    %cst_7 = arith.constant 2.000000e+00 : f32
    %12 = vector.broadcast %cst_7 : f32 to vector<8x128xf32>
    %13 = arith.addf %11, %12 : vector<8x128xf32>
    %14 = tpu.reciprocal %13 {approx = true} : vector<8x128xf32> -> vector<8x128xf32>
    %15 = arith.mulf %11, %14 : vector<8x128xf32>
    %cst_8 = arith.constant 2.000000e+01 : f32
    %16 = vector.broadcast %cst_8 : f32 to vector<8x128xf32>
    %17 = arith.cmpf ogt, %5, %16 : vector<8x128xf32>
    %18 = arith.mulf %5, %15 : vector<8x128xf32>
    %19 = arith.select %17, %5, %18 : vector<8x128xi1>, vector<8x128xf32>
    %c0_9 = arith.constant 0 : index
    %c0_10 = arith.constant 0 : index
    %20 = vector.load %arg4[%c0_9, %c0_10] : memref<128x128xf32, #tpu.memory_space<vmem>>, vector<128x128xf32>
    %cst_11 = arith.constant dense<0.000000e+00> : vector<8x128xf32>
    %21 = tpu.matmul %19, %20, %cst_11 {dimension_numbers = #tpu.dot_dimension_numbers<[1], [0], [0], [1], [0, 0, 1, 1], [], []>} : vector<8x128xf32>, vector<128x128xf32>, vector<8x128xf32> -> vector<8x128xf32>
    %c0_12 = arith.constant 0 : index
    %c0_13 = arith.constant 0 : index
    %22 = vector.load %arg5[%c0_12, %c0_13] : memref<1x128xf32, #tpu.memory_space<vmem>>, vector<1x128xf32>
    %23 = vector.broadcast %22 : vector<1x128xf32> to vector<8x128xf32>
    %24 = arith.addf %21, %23 : vector<8x128xf32>
    %c0_14 = arith.constant 0 : index
    %c0_15 = arith.constant 0 : index
    %25 = vector.load %arg6[%c0_14, %c0_15] : memref<128x128xf32, #tpu.memory_space<vmem>>, vector<128x128xf32>
    %cst_16 = arith.constant dense<0.000000e+00> : vector<8x128xf32>
    %26 = tpu.matmul %24, %25, %cst_16 {dimension_numbers = #tpu.dot_dimension_numbers<[1], [0], [0], [1], [0, 0, 1, 1], [], []>} : vector<8x128xf32>, vector<128x128xf32>, vector<8x128xf32> -> vector<8x128xf32>
    %c0_17 = arith.constant 0 : index
    %c0_18 = arith.constant 0 : index
    %27 = vector.load %arg7[%c0_17, %c0_18] : memref<1x128xf32, #tpu.memory_space<vmem>>, vector<1x128xf32>
    %28 = vector.broadcast %27 : vector<1x128xf32> to vector<8x128xf32>
    %29 = arith.addf %26, %28 : vector<8x128xf32>
    %cst_19 = arith.constant 2.000000e+01 : f32
    %30 = vector.broadcast %cst_19 : f32 to vector<8x128xf32>
    %31 = arith.minimumf %29, %30 : vector<8x128xf32>
    %32 = math.exp %31 : vector<8x128xf32>
    %cst_20 = arith.constant 2.000000e+00 : f32
    %33 = vector.broadcast %cst_20 : f32 to vector<8x128xf32>
    %34 = arith.addf %32, %33 : vector<8x128xf32>
    %35 = arith.mulf %32, %34 : vector<8x128xf32>
    %cst_21 = arith.constant 2.000000e+00 : f32
    %36 = vector.broadcast %cst_21 : f32 to vector<8x128xf32>
    %37 = arith.addf %35, %36 : vector<8x128xf32>
    %38 = tpu.reciprocal %37 {approx = true} : vector<8x128xf32> -> vector<8x128xf32>
    %39 = arith.mulf %35, %38 : vector<8x128xf32>
    %cst_22 = arith.constant 2.000000e+01 : f32
    %40 = vector.broadcast %cst_22 : f32 to vector<8x128xf32>
    %41 = arith.cmpf ogt, %29, %40 : vector<8x128xf32>
    %42 = arith.mulf %29, %39 : vector<8x128xf32>
    %43 = arith.select %41, %29, %42 : vector<8x128xi1>, vector<8x128xf32>
    %c0_23 = arith.constant 0 : index
    %c0_24 = arith.constant 0 : index
    %44 = vector.load %arg8[%c0_23, %c0_24] : memref<128x128xf32, #tpu.memory_space<vmem>>, vector<128x128xf32>
    %cst_25 = arith.constant dense<0.000000e+00> : vector<8x128xf32>
    %45 = tpu.matmul %43, %44, %cst_25 {dimension_numbers = #tpu.dot_dimension_numbers<[1], [0], [0], [1], [0, 0, 1, 1], [], []>} : vector<8x128xf32>, vector<128x128xf32>, vector<8x128xf32> -> vector<8x128xf32>
    %c0_26 = arith.constant 0 : index
    %c0_27 = arith.constant 0 : index
    %46 = vector.load %arg9[%c0_26, %c0_27] : memref<1x128xf32, #tpu.memory_space<vmem>>, vector<1x128xf32>
    %47 = vector.broadcast %46 : vector<1x128xf32> to vector<8x128xf32>
    %48 = arith.addf %45, %47 : vector<8x128xf32>
    %49 = arith.mulf %48, %48 : vector<8x128xf32>
    %cst_28 = arith.constant dense<0.000000e+00> : vector<8xf32>
    %50 = vector.multi_reduction <add>, %49, %cst_28 [1] : vector<8x128xf32> to vector<8xf32>
    %51 = vector.shape_cast %50 : vector<8xf32> to vector<8x1xf32>
    %cst_29 = arith.constant 1.000000e-24 : f32
    %52 = vector.broadcast %cst_29 : f32 to vector<8x1xf32>
    %53 = arith.maximumf %51, %52 : vector<8x1xf32>
    %54 = math.rsqrt %53 : vector<8x1xf32>
    %55 = vector.broadcast %54 : vector<8x1xf32> to vector<8x128xf32>
    %56 = arith.mulf %48, %55 : vector<8x128xf32>
    %c0_30 = arith.constant 0 : index
    %c0_31 = arith.constant 0 : index
    %57 = vector.load %arg10[%c0_30, %c0_31] : memref<8x128xf32, #tpu.memory_space<vmem>>, vector<8x128xf32>
    tpu.vector_store %arg10[%c0_30, %c0_31], %56 {strides = array<i32>} : memref<8x128xf32, #tpu.memory_space<vmem>>, vector<8x128xf32>,
    return
  }
  func.func @transform_0(%arg0: i32) -> (i32, i32) {
    %c0_i32 = arith.constant 0 : i32
    %c0_i32_0 = arith.constant 0 : i32
    return %arg0, %c0_i32 : i32, i32
  }
  func.func @transform_1(%arg0: i32) -> (i32, i32) {
    %c0_i32 = arith.constant 0 : i32
    %c0_i32_0 = arith.constant 0 : i32
    %c0_i32_1 = arith.constant 0 : i32
    return %c0_i32, %c0_i32_0 : i32, i32
  }
  func.func @transform_2(%arg0: i32) -> (i32, i32) {
    %c0_i32 = arith.constant 0 : i32
    %c0_i32_0 = arith.constant 0 : i32
    %c0_i32_1 = arith.constant 0 : i32
    return %c0_i32, %c0_i32_0 : i32, i32
  }
  func.func @transform_3(%arg0: i32) -> (i32, i32) {
    %c0_i32 = arith.constant 0 : i32
    %c0_i32_0 = arith.constant 0 : i32
    %c0_i32_1 = arith.constant 0 : i32
    return %c0_i32, %c0_i32_0 : i32, i32
  }
  func.func @transform_4(%arg0: i32) -> (i32, i32) {
    %c0_i32 = arith.constant 0 : i32
    %c0_i32_0 = arith.constant 0 : i32
    %c0_i32_1 = arith.constant 0 : i32
    return %c0_i32, %c0_i32_0 : i32, i32
  }
  func.func @transform_5(%arg0: i32) -> (i32, i32) {
    %c0_i32 = arith.constant 0 : i32
    %c0_i32_0 = arith.constant 0 : i32
    %c0_i32_1 = arith.constant 0 : i32
    return %c0_i32, %c0_i32_0 : i32, i32
  }
  func.func @transform_6(%arg0: i32) -> (i32, i32) {
    %c0_i32 = arith.constant 0 : i32
    %c0_i32_0 = arith.constant 0 : i32
    %c0_i32_1 = arith.constant 0 : i32
    return %c0_i32, %c0_i32_0 : i32, i32
  }
  func.func @transform_7(%arg0: i32) -> (i32, i32) {
    %c0_i32 = arith.constant 0 : i32
    %c0_i32_0 = arith.constant 0 : i32
    %c0_i32_1 = arith.constant 0 : i32
    return %c0_i32, %c0_i32_0 : i32, i32
  }
  func.func @transform_8(%arg0: i32) -> (i32, i32) {
    %c0_i32 = arith.constant 0 : i32
    %c0_i32_0 = arith.constant 0 : i32
    %c0_i32_1 = arith.constant 0 : i32
    return %c0_i32, %c0_i32_0 : i32, i32
  }
  func.func @transform_9(%arg0: i32) -> (i32, i32) {
    %c0_i32 = arith.constant 0 : i32
    %c0_i32_0 = arith.constant 0 : i32
    return %arg0, %c0_i32 : i32, i32
  }
}

</mosaic_0001>

<bundles_post_ra>
// kernel: inertial_encoder_forward.1
= control target key start
LH: loop header
LB: loop body
LE: loop exit
PB: predicated region body
PF: predicated region fallthrough
CT: control target
= control target key end

     0   :  { %s1654_s0 = inlined_call_operand.vmem [shape: f32[8,640], index: 0, kind: input, shape index: {}]   ;;  %s1655_s1 = inlined_call_operand.vmem [shape: f32[640,128], index: 1, kind: input, shape index: {}]   ;;  %s1656_s2 = inlined_call_operand.vmem [shape: f32[1,128], index: 2, kind: input, shape index: {}]   ;;  %s1657_s3 = inlined_call_operand.vmem [shape: f32[128,128], index: 3, kind: input, shape index: {}]   ;;  %s1658_s4 = inlined_call_operand.vmem [shape: f32[1,128], index: 4, kind: input, shape index: {}]   ;;  %s1659_s5 = inlined_call_operand.vmem [shape: f32[128,128], index: 5, kind: input, shape index: {}]   ;;  %s1660_s6 = inlined_call_operand.vmem [shape: f32[1,128], index: 6, kind: input, shape index: {}]   ;;  %s1661_s7 = inlined_call_operand.vmem [shape: f32[128,128], index: 7, kind: input, shape index: {}]   ;;  %s1662_s8 = inlined_call_operand.vmem [shape: f32[1,128], index: 8, kind: input, shape index: {}]   ;;  %s1663_s9 = inlined_call_operand.hbm [shape: f32[8,128], index: 9, kind: output, shape index: {}]  }
   0x1   :  { %v54_v0 = vld [vmem:[%s1655_s1 + $0x80] sm:$0xff]  ;;  %v55_v1 = vld [vmem:[%s1655_s1 + $0x88] sm:$0xff]  ;;  %v56_v11 = vld [vmem:[%s1655_s1 + $0x90] sm:$0xff] }
   0x2   :  { %v38_v2 = vld [vmem:[%s1655_s1] sm:$0xff]  ;;  %v939_v3 = vpack.c.bf16 %v55_v1, %v54_v0  ;;  %v39_v4 = vld [vmem:[%s1655_s1 + $0x8] sm:$0xff]  ;;  %v57_v13 = vld [vmem:[%s1655_s1 + $0x98] sm:$0xff] }
   0x3   :  { %v86_v5 = vld [vmem:[%s1655_s1 + $0x180] sm:$0xff]  ;;  %v87_v6 = vld [vmem:[%s1655_s1 + $0x188] sm:$0xff]  ;;  %v941_v7 = vpack.c.bf16 %v39_v4, %v38_v2  ;;  %v40_v14 = vld [vmem:[%s1655_s1 + $0x10] sm:$0xff]  ;;  %v943_v16 = vpack.c.bf16 %v57_v13, %v56_v11 }
   0x4   :  { %v971_v8 = vpack.c.bf16 %v87_v6, %v86_v5  ;;  %v70_v9 = vld [vmem:[%s1655_s1 + $0x100] sm:$0xff]  ;;  %v71_v10 = vld [vmem:[%s1655_s1 + $0x108] sm:$0xff]  ;;  %940 = vmatprep.subr.bf16.mxu0 %v939_v3  ;;  %v41_v15 = vld [vmem:[%s1655_s1 + $0x18] sm:$0xff] }
   0x5   :  { %v973_v12 = vpack.c.bf16 %v71_v10, %v70_v9  ;;  %942 = vmatpush3.bf16.msra.mxu0 %v941_v7  ;;  %v945_v17 = vpack.c.bf16 %v41_v15, %v40_v14  ;;  %v88_v18 = vld [vmem:[%s1655_s1 + $0x190] sm:$0xff]  ;;  %v89_v19 = vld [vmem:[%s1655_s1 + $0x198] sm:$0xff]  ;;  %v58_v23 = vld [vmem:[%s1655_s1 + $0xa0] sm:$0xff] }
   0x6   :  { %972 = vmatprep.subr.bf16.mxu1 %v971_v8  ;;  %v72_v20 = vld [vmem:[%s1655_s1 + $0x110] sm:$0xff]  ;;  %v975_v21 = vpack.c.bf16 %v89_v19, %v88_v18  ;;  %v73_v22 = vld [vmem:[%s1655_s1 + $0x118] sm:$0xff]  ;;  %v59_v24 = vld [vmem:[%s1655_s1 + $0xa8] sm:$0xff]  ;;  %944 = vmatprep.subr.bf16.mxu0 %v943_v16 }
   0x7   :  { %974 = vmatpush3.bf16.msra.mxu1 %v973_v12  ;;  %v977_v25 = vpack.c.bf16 %v73_v22, %v72_v20  ;;  %v947_v26 = vpack.c.bf16 %v59_v24, %v58_v23  ;;  %v42_v27 = vld [vmem:[%s1655_s1 + $0x20] sm:$0xff]  ;;  %v43_v28 = vld [vmem:[%s1655_s1 + $0x28] sm:$0xff]  ;;  %v60_v35 = vld [vmem:[%s1655_s1 + $0xb0] sm:$0xff] }
   0x8   :  { %v90_v29 = vld [vmem:[%s1655_s1 + $0x1a0] sm:$0xff]  ;;  %976 = vmatprep.subr.bf16.mxu1 %v975_v21  ;;  %v91_v30 = vld [vmem:[%s1655_s1 + $0x1a8] sm:$0xff]  ;;  %v949_v33 = vpack.c.bf16 %v43_v28, %v42_v27  ;;  %v61_v36 = vld [vmem:[%s1655_s1 + $0xb8] sm:$0xff] }
   0x9   :  { %v74_v31 = vld [vmem:[%s1655_s1 + $0x120] sm:$0xff]  ;;  %v75_v32 = vld [vmem:[%s1655_s1 + $0x128] sm:$0xff]  ;;  %946 = vmatpush3.bf16.msra.mxu0 %v945_v17  ;;  %v979_v34 = vpack.c.bf16 %v91_v30, %v90_v29  ;;  %v44_v37 = vld [vmem:[%s1655_s1 + $0x30] sm:$0xff]  ;;  %v951_v39 = vpack.c.bf16 %v61_v36, %v60_v35 }
   0xa   :  { %948 = vmatprep.subr.bf16.mxu0 %v947_v26  ;;  %v981_v38 = vpack.c.bf16 %v75_v32, %v74_v31  ;;  %v45_v40 = vld [vmem:[%s1655_s1 + $0x38] sm:$0xff]  ;;  %v92_v41 = vld [vmem:[%s1655_s1 + $0x1b0] sm:$0xff]  ;;  %v62_v46 = vld [vmem:[%s1655_s1 + $0xc0] sm:$0xff] }
   0xb   :  { %978 = vmatpush3.bf16.msra.mxu1 %v977_v25  ;;  %v93_v42 = vld [vmem:[%s1655_s1 + $0x1b8] sm:$0xff]  ;;  %v76_v44 = vld [vmem:[%s1655_s1 + $0x130] sm:$0xff]  ;;  %v63_v47 = vld [vmem:[%s1655_s1 + $0xc8] sm:$0xff]  ;;  %v953_v48 = vpack.c.bf16 %v45_v40, %v44_v37 }
   0xc   :  { %980 = vmatprep.subr.bf16.mxu1 %v979_v34  ;;  %v983_v43 = vpack.c.bf16 %v93_v42, %v92_v41  ;;  %v77_v45 = vld [vmem:[%s1655_s1 + $0x138] sm:$0xff]  ;;  %v94_v49 = vld [vmem:[%s1655_s1 + $0x1c0] sm:$0xff]  ;;  %v95_v50 = vld [vmem:[%s1655_s1 + $0x1c8] sm:$0xff]  ;;  %v955_v52 = vpack.c.bf16 %v63_v47, %v62_v46 }
   0xd   :  { %950 = vmatpush3.bf16.msra.mxu0 %v949_v33  ;;  %v985_v51 = vpack.c.bf16 %v77_v45, %v76_v44  ;;  %v46_v53 = vld [vmem:[%s1655_s1 + $0x40] sm:$0xff]  ;;  %v47_v54 = vld [vmem:[%s1655_s1 + $0x48] sm:$0xff]  ;;  %v987_v56 = vpack.c.bf16 %v95_v50, %v94_v49  ;;  %v64_v58 = vld [vmem:[%s1655_s1 + $0xd0] sm:$0xff] }
   0xe   :  { %952 = vmatprep.subr.bf16.mxu0 %v951_v39  ;;  %v78_v55 = vld [vmem:[%s1655_s1 + $0x140] sm:$0xff]  ;;  %v79_v57 = vld [vmem:[%s1655_s1 + $0x148] sm:$0xff]  ;;  %v65_v59 = vld [vmem:[%s1655_s1 + $0xd8] sm:$0xff]  ;;  %v957_v62 = vpack.c.bf16 %v47_v54, %v46_v53 }
   0xf   :  { %982 = vmatpush3.bf16.msra.mxu1 %v981_v38  ;;  %v96_v60 = vld [vmem:[%s1655_s1 + $0x1d0] sm:$0xff]  ;;  %v97_v61 = vld [vmem:[%s1655_s1 + $0x1d8] sm:$0xff]  ;;  %v989_v63 = vpack.c.bf16 %v79_v57, %v78_v55  ;;  %v959_v0 = vpack.c.bf16 %v65_v59, %v64_v58  ;;  %v66_v6 = vld [vmem:[%s1655_s1 + $0xe0] sm:$0xff] }
  0x10   :  { %984 = vmatprep.subr.bf16.mxu1 %v983_v43  ;;  %v48_v1 = vld [vmem:[%s1655_s1 + $0x50] sm:$0xff]  ;;  %v49_v2 = vld [vmem:[%s1655_s1 + $0x58] sm:$0xff]  ;;  %v991_v4 = vpack.c.bf16 %v97_v61, %v96_v60  ;;  %v67_v7 = vld [vmem:[%s1655_s1 + $0xe8] sm:$0xff] }
  0x11   :  { %954 = vmatpush3.bf16.msra.mxu0 %v953_v48  ;;  %v80_v3 = vld [vmem:[%s1655_s1 + $0x150] sm:$0xff]  ;;  %v81_v5 = vld [vmem:[%s1655_s1 + $0x158] sm:$0xff]  ;;  %v98_v8 = vld [vmem:[%s1655_s1 + $0x1e0] sm:$0xff]  ;;  %v961_v10 = vpack.c.bf16 %v49_v2, %v48_v1  ;;  %v963_v14 = vpack.c.bf16 %v67_v7, %v66_v6 }
  0x12   :  { %956 = vmatprep.subr.bf16.mxu0 %v955_v52  ;;  %v99_v9 = vld [vmem:[%s1655_s1 + $0x1e8] sm:$0xff]  ;;  %v50_v11 = vld [vmem:[%s1655_s1 + $0x60] sm:$0xff]  ;;  %v993_v13 = vpack.c.bf16 %v81_v5, %v80_v3  ;;  %v68_v19 = vld [vmem:[%s1655_s1 + $0xf0] sm:$0xff] }
  0x13   :  { %986 = vmatpush3.bf16.msra.mxu1 %v985_v51  ;;  %v34_v12 = vld [vmem:[%s1654_s0 + $0x8] sm:$0xff]  ;;  %v82_v16 = vld [vmem:[%s1655_s1 + $0x160] sm:$0xff]  ;;  %v995_v18 = vpack.c.bf16 %v99_v9, %v98_v8  ;;  %v69_v20 = vld [vmem:[%s1655_s1 + $0xf8] sm:$0xff] }
  0x14   :  { %988 = vmatprep.subr.bf16.mxu1 %v987_v56  ;;  %v51_v15 = vld [vmem:[%s1655_s1 + $0x68] sm:$0xff]  ;;  %189 = vmatprep.mubr.f32.mxu0 %v34_v12  ;;  %v36_v21 = vld [vmem:[%s1654_s0 + $0x18] sm:$0xff]  ;;  %v100_v22 = vld [vmem:[%s1655_s1 + $0x1f0] sm:$0xff]  ;;  %v967_v26 = vpack.c.bf16 %v69_v20, %v68_v19 }
  0x15   :  { %958 = vmatpush3.bf16.msra.mxu0 %v957_v62  ;;  %v83_v17 = vld [vmem:[%s1655_s1 + $0x168] sm:$0xff]  ;;  %v101_v23 = vld [vmem:[%s1655_s1 + $0x1f8] sm:$0xff]  ;;  %259 = vmatprep.mubr.f32.mxu1 %v36_v21  ;;  %v965_v24 = vpack.c.bf16 %v51_v15, %v50_v11  ;;  %v52_v27 = vld [vmem:[%s1655_s1 + $0x70] sm:$0xff] }
  0x16   :  { %960 = vmatprep.subr.bf16.mxu0 %v959_v0  ;;  %v997_v25 = vpack.c.bf16 %v83_v17, %v82_v16  ;;  %v53_v28 = vld [vmem:[%s1655_s1 + $0x78] sm:$0xff]  ;;  %v999_v29 = vpack.c.bf16 %v101_v23, %v100_v22  ;;  %v84_v30 = vld [vmem:[%s1655_s1 + $0x170] sm:$0xff] }
  0x17   :  { %990 = vmatpush3.bf16.msra.mxu1 %v989_v63  ;;  %v85_v31 = vld [vmem:[%s1655_s1 + $0x178] sm:$0xff]  ;;  %v969_v32 = vpack.c.bf16 %v53_v28, %v52_v27 }
  0x18   :  { %992 = vmatprep.subr.bf16.mxu1 %v991_v4 }
  0x19   :  { %962 = vmatpush3.bf16.msra.mxu0 %v961_v10 }
  0x1a   :  { %964 = vmatprep.subr.bf16.mxu0 %v963_v14 }
  0x1b   :  { %994 = vmatpush3.bf16.msra.mxu1 %v993_v13 }
  0x1c   :  { %996 = vmatprep.subr.bf16.mxu1 %v995_v18 }
  0x1d   :  { %966 = vmatpush3.bf16.msra.mxu0 %v965_v24 }
  0x1e   :  { %14 = vsyncpa [#allocation3], 0  ;;  %968 = vmatprep.subr.bf16.mxu0 %v967_v26  ;;  %v1001_v33 = vpack.c.bf16 %v85_v31, %v84_v30  ;;  %v102_v34 = vld [vmem:[%s1655_s1 + $0x200] sm:$0xff]  ;;  %v103_v35 = vld [vmem:[%s1655_s1 + $0x208] sm:$0xff]  ;;  %v1137_v38 = vmov 0.0|0.0   ;;  %vm1138_vm0 = vmmov 0  }
  0x1f   :  { %998 = vmatpush3.bf16.msra.mxu1 %v997_v25  ;;  %v33_v36 = vld [vmem:[%s1654_s0] sm:$0xff]  ;;  %v1004_v37 = vpack.c.bf16 %v103_v35, %v102_v34  ;;  %v35_v39 = vld [vmem:[%s1654_s0 + $0x10] sm:$0xff]  ;;  %v105_v41 = vld [vmem:[%s1655_s1 + $0x218] sm:$0xff]  ;;  %v1139_v45 = vmov 0.0  }
  0x20   :  { %1000 = vmatprep.subr.bf16.mxu1 %v999_v29  ;;  %v104_v40 = vld [vmem:[%s1655_s1 + $0x210] sm:$0xff]  ;;  %v106_v43 = vld [vmem:[%s1655_s1 + $0x220] sm:$0xff]  ;;  %v107_v44 = vld [vmem:[%s1655_s1 + $0x228] sm:$0xff] }
  0x21   :  { %970 = vmatpush3.bf16.msra.mxu0 %v969_v32  ;;  %v1007_v42 = vpack.c.bf16 %v105_v41, %v104_v40  ;;  %v1010_v46 = vpack.c.bf16 %v107_v44, %v106_v43  ;;  %v108_v47 = vld [vmem:[%s1655_s1 + $0x230] sm:$0xff]  ;;  %v109_v48 = vld [vmem:[%s1655_s1 + $0x238] sm:$0xff]  ;;  %v110_v50 = vld [vmem:[%s1655_s1 + $0x240] sm:$0xff] }
  0x22   :  { %1003 = vmatprep.subr.bf16.mxu0 %v1137_v38  ;;  %v1013_v49 = vpack.c.bf16 %v109_v48, %v108_v47  ;;  %v111_v51 = vld [vmem:[%s1655_s1 + $0x248] sm:$0xff]  ;;  %v112_v53 = vld [vmem:[%s1655_s1 + $0x250] sm:$0xff]  ;;  %v113_v54 = vld [vmem:[%s1655_s1 + $0x258] sm:$0xff] }
  0x23   :  { %1002 = vmatpush3.bf16.msra.mxu1 %v1001_v33  ;;  %v1016_v52 = vpack.c.bf16 %v111_v51, %v110_v50  ;;  %v1019_v55 = vpack.c.bf16 %v113_v54, %v112_v53  ;;  %v114_v56 = vld [vmem:[%s1655_s1 + $0x260] sm:$0xff]  ;;  %v115_v57 = vld [vmem:[%s1655_s1 + $0x268] sm:$0xff]  ;;  %v116_v59 = vld [vmem:[%s1655_s1 + $0x270] sm:$0xff] }
  0x24   :  { %1027 = vmatprep.subr.bf16.mxu1 %v1137_v38  ;;  %190 = vmatmul.mubr.f32.vlgmr.msra.gmra.mrb[0].mxu0 %v33_v36  ;;  %v1022_v58 = vpack.c.bf16 %v115_v57, %v114_v56  ;;  %v117_v60 = vld [vmem:[%s1655_s1 + $0x278] sm:$0xff]  ;;  %v37_v62 = vld [vmem:[%s1654_s0 + $0x20] sm:$0xff]  ;;  %v347_v0 = vld [vmem:[%s1657_s3 + $0x8] sm:$0xff] }
  0x25   :  { %1005 = vmatpush3.bf16.msra.mxu0 %v1004_v37  ;;  %831 = vmatprep.mubr.msk.f32.mxu0 %vm1138_vm0, %v1139_v45  ;;  %v1025_v61 = vpack.c.bf16 %v117_v60, %v116_v59  ;;  %v346_v63 = vld [vmem:[%s1657_s3] sm:$0xff]  ;;  %v348_v2 = vld [vmem:[%s1657_s3 + $0x10] sm:$0xff]  ;;  %v349_v3 = vld [vmem:[%s1657_s3 + $0x18] sm:$0xff] }
  0x26   :  { %260 = vmatmul.mubr.f32.vlgmr.msra.gmra.mrb[0].mxu1 %v35_v39  ;;  %1006 = vmatprep.subr.bf16.mxu0 %v1137_v38  ;;  %v1028_v1 = vpack.c.bf16 %v347_v0, %v346_v63  ;;  %v1031_v4 = vpack.c.bf16 %v349_v3, %v348_v2  ;;  %v350_v5 = vld [vmem:[%s1657_s3 + $0x20] sm:$0xff]  ;;  %v351_v6 = vld [vmem:[%s1657_s3 + $0x28] sm:$0xff]  ;;  %v352_v8 = vld [vmem:[%s1657_s3 + $0x30] sm:$0xff] }
  0x27   :  { %866 = vmatprep.mubr.msk.f32.mxu1 %vm1138_vm0, %v1139_v45  ;;  %v1034_v7 = vpack.c.bf16 %v351_v6, %v350_v5  ;;  %v353_v9 = vld [vmem:[%s1657_s3 + $0x38] sm:$0xff]  ;;  %v354_v11 = vld [vmem:[%s1657_s3 + $0x40] sm:$0xff]  ;;  %v355_v12 = vld [vmem:[%s1657_s3 + $0x48] sm:$0xff] }
  0x28   :  { %1029 = vmatpush3.bf16.msra.mxu1 %v1028_v1  ;;  %v1037_v10 = vpack.c.bf16 %v353_v9, %v352_v8  ;;  %v1040_v13 = vpack.c.bf16 %v355_v12, %v354_v11  ;;  %v356_v14 = vld [vmem:[%s1657_s3 + $0x50] sm:$0xff]  ;;  %v357_v15 = vld [vmem:[%s1657_s3 + $0x58] sm:$0xff]  ;;  %v358_v17 = vld [vmem:[%s1657_s3 + $0x60] sm:$0xff] }
  0x29   :  { %1008 = vmatpush3.bf16.msra.mxu0 %v1007_v42  ;;  %1030 = vmatprep.subr.bf16.mxu1 %v1137_v38  ;;  %v1043_v16 = vpack.c.bf16 %v357_v15, %v356_v14  ;;  %v359_v18 = vld [vmem:[%s1657_s3 + $0x68] sm:$0xff]  ;;  %v360_v20 = vld [vmem:[%s1657_s3 + $0x70] sm:$0xff]  ;;  %v361_v21 = vld [vmem:[%s1657_s3 + $0x78] sm:$0xff] }
  0x2a   :  { %1009 = vmatprep.subr.bf16.mxu0 %v1137_v38  ;;  %v1046_v19 = vpack.c.bf16 %v359_v18, %v358_v17  ;;  %v1049_v22 = vpack.c.bf16 %v361_v21, %v360_v20  ;;  %v439_v23 = vld [vmem:[%s1659_s5] sm:$0xff]  ;;  %v440_v24 = vld [vmem:[%s1659_s5 + $0x8] sm:$0xff]  ;;  %v441_v25 = vld [vmem:[%s1659_s5 + $0x10] sm:$0xff] }
  0x2b   :  { %v1052_v26 = vpack.c.bf16 %v440_v24, %v439_v23  ;;  %v442_v27 = vld [vmem:[%s1659_s5 + $0x18] sm:$0xff]  ;;  %v443_v29 = vld [vmem:[%s1659_s5 + $0x20] sm:$0xff]  ;;  %v444_v30 = vld [vmem:[%s1659_s5 + $0x28] sm:$0xff] }
  0x2c   :  { %1032 = vmatpush3.bf16.msra.mxu1 %v1031_v4  ;;  %v1055_v28 = vpack.c.bf16 %v442_v27, %v441_v25  ;;  %v1058_v31 = vpack.c.bf16 %v444_v30, %v443_v29  ;;  %v445_v32 = vld [vmem:[%s1659_s5 + $0x30] sm:$0xff]  ;;  %v446_v33 = vld [vmem:[%s1659_s5 + $0x38] sm:$0xff]  ;;  %v447_v35 = vld [vmem:[%s1659_s5 + $0x40] sm:$0xff] }
  0x2d   :  { %1011 = vmatpush3.bf16.msra.mxu0 %v1010_v46  ;;  %1033 = vmatprep.subr.bf16.mxu1 %v1137_v38  ;;  %v1061_v34 = vpack.c.bf16 %v446_v33, %v445_v32  ;;  %v448_v36 = vld [vmem:[%s1659_s5 + $0x48] sm:$0xff]  ;;  %v449_v39 = vld [vmem:[%s1659_s5 + $0x50] sm:$0xff]  ;;  %v450_v40 = vld [vmem:[%s1659_s5 + $0x58] sm:$0xff] }
  0x2e   :  { %1012 = vmatprep.subr.bf16.mxu0 %v1137_v38  ;;  %v1064_v37 = vpack.c.bf16 %v448_v36, %v447_v35  ;;  %v1067_v41 = vpack.c.bf16 %v450_v40, %v449_v39  ;;  %v451_v42 = vld [vmem:[%s1659_s5 + $0x60] sm:$0xff]  ;;  %v452_v43 = vld [vmem:[%s1659_s5 + $0x68] sm:$0xff]  ;;  %v453_v4 = vld [vmem:[%s1659_s5 + $0x70] sm:$0xff] }
  0x2f   :  { %v1070_v44 = vpack.c.bf16 %v452_v43, %v451_v42  ;;  %v657_v47 = vld [vmem:[%s1656_s2] ss:$0 sm:$0xff]  ;;  %v454_v5 = vld [vmem:[%s1659_s5 + $0x78] sm:$0xff]  ;;  %v544_v11 = vld [vmem:[%s1661_s7 + $0x8] sm:$0xff] }
  0x30   :  { %1035 = vmatpush3.bf16.msra.mxu1 %v1034_v7  ;;  %v1073_v6 = vpack.c.bf16 %v454_v5, %v453_v4  ;;  %v658_v7 = vld [vmem:[%s1658_s4] ss:$0 sm:$0xff]  ;;  %v546_v14 = vld [vmem:[%s1661_s7 + $0x18] sm:$0xff]  ;;  %v548_v17 = vld [vmem:[%s1661_s7 + $0x28] sm:$0xff] }
  0x31   :  { %1014 = vmatpush3.bf16.msra.mxu0 %v1013_v49  ;;  %1036 = vmatprep.subr.bf16.mxu1 %v1137_v38  ;;  %v550_v20 = vld [vmem:[%s1661_s7 + $0x38] sm:$0xff]  ;;  %v552_v23 = vld [vmem:[%s1661_s7 + $0x48] sm:$0xff]  ;;  %v553_v25 = vld [vmem:[%s1661_s7 + $0x50] sm:$0xff] }
  0x32   :  { %1015 = vmatprep.subr.bf16.mxu0 %v1137_v38  ;;  %v556_v29 = vld [vmem:[%s1661_s7 + $0x68] sm:$0xff]  ;;  %v558_v32 = vld [vmem:[%s1661_s7 + $0x78] sm:$0xff] }
  0x34   :  { %1038 = vmatpush3.bf16.msra.mxu1 %v1037_v10 }
  0x35   :  { %1017 = vmatpush3.bf16.msra.mxu0 %v1016_v52  ;;  %1039 = vmatprep.subr.bf16.mxu1 %v1137_v38 }
  0x36   :  { %1018 = vmatprep.subr.bf16.mxu0 %v1137_v38 }
  0x38   :  { %1041 = vmatpush3.bf16.msra.mxu1 %v1040_v13  ;;  %v545_v13 = vld [vmem:[%s1661_s7 + $0x10] sm:$0xff] }
  0x39   :  { %1020 = vmatpush3.bf16.msra.mxu0 %v1019_v55  ;;  %1042 = vmatprep.subr.bf16.mxu1 %v1137_v38  ;;  %v1079_v15 = vpack.c.bf16 %v546_v14, %v545_v13 }
  0x3a   :  { %1021 = vmatprep.subr.bf16.mxu0 %v1137_v38 }
  0x3c   :  { %1044 = vmatpush3.bf16.msra.mxu1 %v1043_v16  ;;  %v547_v16 = vld [vmem:[%s1661_s7 + $0x20] sm:$0xff] }
  0x3d   :  { %1023 = vmatpush3.bf16.msra.mxu0 %v1022_v58  ;;  %1045 = vmatprep.subr.bf16.mxu1 %v1137_v38  ;;  %v1082_v18 = vpack.c.bf16 %v548_v17, %v547_v16 }
  0x3e   :  { %1024 = vmatprep.subr.bf16.mxu0 %v1137_v38 }
  0x40   :  { %1047 = vmatpush3.bf16.msra.mxu1 %v1046_v19  ;;  %v549_v19 = vld [vmem:[%s1661_s7 + $0x30] sm:$0xff] }
  0x41   :  { %1026 = vmatpush3.bf16.msra.mxu0 %v1025_v61  ;;  %1048 = vmatprep.subr.bf16.mxu1 %v1137_v38  ;;  %v1085_v21 = vpack.c.bf16 %v550_v20, %v549_v19 }
  0x42   :  { %1051 = vmatprep.subr.bf16.mxu0 %v1137_v38 }
  0x44   :  { %832 = vmatmul.mubr.f32.vlgmr.msra.gmra.mrb[2].mxu0 %v37_v62  ;;  %1050 = vmatpush3.bf16.msra.mxu1 %v1049_v22  ;;  %v551_v22 = vld [vmem:[%s1661_s7 + $0x40] sm:$0xff] }
  0x45   :  { %901 = vmatprep.mubr.msk.f32.mxu0 %vm1138_vm0, %v1139_v45  ;;  %1075 = vmatprep.subr.bf16.mxu1 %v1137_v38  ;;  %v1088_v24 = vpack.c.bf16 %v552_v23, %v551_v22 }
  0x46   :  { %1053 = vmatpush3.bf16.msra.mxu0 %v1052_v26  ;;  %v554_v26 = vld [vmem:[%s1661_s7 + $0x58] sm:$0xff] }
  0x47   :  { %1054 = vmatprep.subr.bf16.mxu0 %v1137_v38  ;;  %v1091_v27 = vpack.c.bf16 %v554_v26, %v553_v25 }
  0x4a   :  { %1056 = vmatpush3.bf16.msra.mxu0 %v1055_v28  ;;  %v555_v28 = vld [vmem:[%s1661_s7 + $0x60] sm:$0xff] }
  0x4b   :  { %1057 = vmatprep.subr.bf16.mxu0 %v1137_v38  ;;  %v1094_v30 = vpack.c.bf16 %v556_v29, %v555_v28 }
  0x4e   :  { %1059 = vmatpush3.bf16.msra.mxu0 %v1058_v31  ;;  %v557_v31 = vld [vmem:[%s1661_s7 + $0x70] sm:$0xff] }
  0x4f   :  { %1060 = vmatprep.subr.bf16.mxu0 %v1137_v38  ;;  %v1097_v33 = vpack.c.bf16 %v558_v32, %v557_v31 }
  0x52   :  { %1062 = vmatpush3.bf16.msra.mxu0 %v1061_v34  ;;  %v659_v34 = vld [vmem:[%s1660_s6] ss:$0 sm:$0xff]  ;;  %s1140_s6 = smov [#allocation2]  }
  0x53   :  { %1063 = vmatprep.subr.bf16.mxu0 %v1137_v38  ;;  %s649_s4 = sshll.u32 %s1140_s6, 4  ;;  %s650_s4 = int_to_ptr.vmem [resolvable:$true] %s649_s4 }
  0x54   :  { %s1113_s13 = scalar_lea.vmem %s650_s4, 128  ;;  %p1118_p1 = scmp.lt.s32.totalorder %s650_s4, %s650_s4 }
  0x55   :  { %p1114_p0 = scmp.ne.s32.totalorder %s650_s4, %s1113_s13  ;;  %p1119_p2 = scmp.lt.s32.totalorder %s1113_s13, %s1113_s13 }
  0x56   :  { %1065 = vmatpush3.bf16.msra.mxu0 %v1064_v37 }
  0x57   :  { %1066 = vmatprep.subr.bf16.mxu0 %v1137_v38  ;;  %p1120_p3 = por %p1119_p2, %p1118_p1 }
  0x59   :  { %p1121_p4 = pnand %p1120_p3, %p1114_p0 }
  0x5a   :  { %1068 = vmatpush3.bf16.msra.mxu0 %v1067_v41 }
  0x5b   :  { %1069 = vmatprep.subr.bf16.mxu0 %v1137_v38 }
  0x5e   :  { %1071 = vmatpush3.bf16.msra.mxu0 %v1070_v44 }
  0x5f   :  { %1072 = vmatprep.subr.bf16.mxu0 %v1137_v38 }
  0x62   :  { %1074 = vmatpush3.bf16.msra.mxu0 %v1073_v6 }
  0xf7   :  { %v693_v46 = vpop.f32.mrb[0].mxu0 }
  0xf8   :  { %v694_v48 = vpop.f32.mrb[1].mxu0 }
  0xf9   :  { %v728_v49 = vpop.f32.mrb[0].mxu1  ;;  %v695_v50 = vadd.f32 %v694_v48, %v693_v46 }
  0xfa   :  { %v729_v51 = vpop.f32.mrb[1].mxu1 }
  0xfb   :  { %v730_v52 = vadd.f32 %v729_v51, %v728_v49  ;;  %v192_v53 = vadd.f32 %v695_v50, %v657_v47  ;;  %v660_v49 = vld [vmem:[%s1662_s8] ss:$0 sm:$0xff] }
  0xfd   :  { %v262_v54 = vadd.f32 %v730_v52, %v192_v53 }
 0x117   :  { %v331_v55 = vpop.f32.mrb[2].mxu0 }
 0x118   :  { %v332_v56 = vadd.f32 %v331_v55, %v262_v54  ;;  %v833_v57 = vpop.f32.mrb[3].mxu0 }
 0x11a   :  { %v335_v58 = vmin.f32 %v332_v56, 20.0  ;;  %vm343_vm1 = vcmp.gt.f32.partialorder %v332_v56, 20.0 }
 0x11c   :  { %v336_v59 = vmul.f32 1.442695, %v335_v58 }
 0x11e   :  { %1103 = vpow2.f32 %v336_v59 }
 0x128   :  { %v1104_v60 = vpop.eup %1103 }
 0x129   :  { %v338_v61 = vadd.f32 2.0, %v1104_v60 }
 0x12b   :  { %v339_v62 = vmul.f32 %v1104_v60, %v338_v61 }
 0x12d   :  { %v340_v63 = vadd.f32 2.0, %v339_v62 }
 0x12f   :  { %1105 = vrcp.f32 %v340_v63 }
 0x139   :  { %v1106_v0 = vpop.eup %1105 }
 0x13a   :  { %v342_v1 = vmul.f32 %v1106_v0, %v339_v62 }
 0x13c   :  { %v344_v2 = vmul.f32 %v342_v1, %v332_v56 }
 0x13e   :  { %v345_v3 = vsel %vm343_vm1, %v332_v56, %v344_v2 }
 0x13f   :  { %867 = vmatmul.mubr.f32.vlgmr.msra.gmra.mrb[2].mxu1 %v345_v3 }
 0x140   :  { %936 = vmatprep.mubr.msk.f32.mxu1 %vm1138_vm0, %v1139_v45  ;;  %v543_v45 = vld [vmem:[%s1661_s7] sm:$0xff] }
 0x141   :  { %v1076_v12 = vpack.c.bf16 %v544_v11, %v543_v45 }
 0x143   :  { %1077 = vmatpush3.bf16.msra.mxu1 %v1076_v12 }
 0x144   :  { %1078 = vmatprep.subr.bf16.mxu1 %v1137_v38 }
 0x147   :  { %1080 = vmatpush3.bf16.msra.mxu1 %v1079_v15 }
 0x148   :  { %1081 = vmatprep.subr.bf16.mxu1 %v1137_v38 }
 0x14b   :  { %1083 = vmatpush3.bf16.msra.mxu1 %v1082_v18 }
 0x14c   :  { %1084 = vmatprep.subr.bf16.mxu1 %v1137_v38 }
 0x14f   :  { %1086 = vmatpush3.bf16.msra.mxu1 %v1085_v21 }
 0x150   :  { %1087 = vmatprep.subr.bf16.mxu1 %v1137_v38 }
 0x153   :  { %1089 = vmatpush3.bf16.msra.mxu1 %v1088_v24 }
 0x154   :  { %1090 = vmatprep.subr.bf16.mxu1 %v1137_v38 }
 0x157   :  { %1092 = vmatpush3.bf16.msra.mxu1 %v1091_v27 }
 0x158   :  { %1093 = vmatprep.subr.bf16.mxu1 %v1137_v38 }
 0x15b   :  { %1095 = vmatpush3.bf16.msra.mxu1 %v1094_v30 }
 0x15c   :  { %1096 = vmatprep.subr.bf16.mxu1 %v1137_v38 }
 0x15f   :  { %1098 = vmatpush3.bf16.msra.mxu1 %v1097_v33 }
 0x212   :  { %v435_v8 = vpop.f32.mrb[2].mxu1 }
 0x213   :  { %v436_v9 = vadd.f32 %v658_v7, %v435_v8  ;;  %v868_v10 = vpop.f32.mrb[3].mxu1 }
 0x215   :  { %902 = vmatmul.mubr.f32.vlgmr.msra.gmra.mrb[4].mxu0 %v436_v9 }
 0x2e8   :  { %v528_v35 = vpop.f32.mrb[4].mxu0 }
 0x2e9   :  { %v529_v36 = vadd.f32 %v659_v34, %v528_v35  ;;  %v903_v37 = vpop.f32.mrb[5].mxu0 }
 0x2eb   :  { %v532_v39 = vmin.f32 %v529_v36, 20.0  ;;  %vm540_vm2 = vcmp.gt.f32.partialorder %v529_v36, 20.0 }
 0x2ed   :  { %v533_v40 = vmul.f32 1.442695, %v532_v39 }
 0x2ef   :  { %1107 = vpow2.f32 %v533_v40 }
 0x2f9   :  { %v1108_v41 = vpop.eup %1107 }
 0x2fa   :  { %v535_v42 = vadd.f32 2.0, %v1108_v41 }
 0x2fc   :  { %v536_v43 = vmul.f32 %v1108_v41, %v535_v42 }
 0x2fe   :  { %v537_v44 = vadd.f32 2.0, %v536_v43 }
 0x300   :  { %1109 = vrcp.f32 %v537_v44 }
 0x30a   :  { %v1110_v46 = vpop.eup %1109 }
 0x30b   :  { %v539_v47 = vmul.f32 %v1110_v46, %v536_v43 }
 0x30d   :  { %v541_v48 = vmul.f32 %v539_v47, %v529_v36 }
 0x30f   :  { %v542_v38 = vsel %vm540_vm2, %v529_v36, %v541_v48 }
 0x310   :  { %937 = vmatmul.mubr.f32.vlgmr.msra.gmra.mrb[4].mxu1 %v542_v38 }
 0x3e3   :  { %v632_v50 = vpop.f32.mrb[4].mxu1 }
 0x3e4   :  { %v633_v51 = vadd.f32 %v660_v49, %v632_v50  ;;  %v938_v52 = vpop.f32.mrb[5].mxu1 }
 0x3e6   :  { %v636_v53 = vmul.f32 %v633_v51, %v633_v51 }
 0x3e8   :  { %637 = vadd.xlane.f32.xlu0 %v636_v53 }
 0x475   :  { %v638_v54 = vpop.xlane.xlu0 %637 }
 0x476   :  { %v639_v55 = vmax.f32 %v638_v54, 1e-24 }
 0x478   :  { %1111 = vrsqrt.f32 %v639_v55 }
 0x482   :  { %v1112_v56 = vpop.eup %1111 }
 0x483   :  { %v641_v57 = vmul.f32 %v1112_v56, %v633_v51 }
 0x485   :  { %642 = vst [vmem:[#allocation2] sm:$0xff] %v641_v57 }
 0x486   :  { %1124 = shalt.err (!%p1121_p4)
}
 0x487   :  { %s1125_s15 = scalar_lea.hbm %s1663_s9, 128 }
 0x488   :  { %p1126_p5 = scmp.ne.s32.totalorder %s1663_s9, %s1125_s15  ;;  %p1129_p6 = scmp.lt.u32.totalorder %s1125_s15, %s1663_s9 }
 0x48a   :  { %p1131_p7 = pnand %p1129_p6, %p1126_p5 }
 0x48c   :  { %1134 = shalt.err (!%p1131_p7)
}
 0x48d   :  { %652 = dma.vmem_to_hbm [thread:$0]  %s650_s4, 128, %s1663_s9, [#allocation3]  }
 0x48e   :  { %1135 = dma.done.wait [#allocation3], 128  }
 0x48f   :  { %1136 = vsyncadd [#allocation3], 4294967168 }
 0x490   :  { %656 = vsyncpa [#allocation3], 1 }

</bundles_post_ra>
